<compile_context>
chip_gen: v5e
topology: v5e:2x2
jax: 0.10.0
libtpu: 0.0.40
codegen_flags: <defaults>
</compile_context>

<pallas_src>
import functools

import jax
import jax.numpy as jnp
from jax import lax
from jax.experimental import pallas as pl
from jax.experimental.pallas import tpu as pltpu


def _round_up(x, m):
    return (x + m - 1) // m * m


def _convmlp_kernel(x_ref, wdw_ref, bdw_ref, w1_ref, b1_ref, w2_ref, b2_ref,
                    o_ref, *, TM, K, HALO, D, eps, inner_chunk, n_chunks):
    # x_ref: (1, Tp, Dp) padded input for one batch element (resident across time tiles)
    i = pl.program_id(1)
    tstart = pl.multiple_of(i * TM, 8)

    # One aligned load of the (TM + HALO)-row halo window; taps are value slices.
    win = x_ref[0, pl.ds(tstart, TM + HALO), :]        # f32 (TM+HALO, Dp)
    wdw = wdw_ref[...]                                 # f32 (K, Dp)

    # ---- depthwise conv over time (groups == channels, cross-correlation) ----
    y = win[0:TM, :] * wdw[0:1, :]
    for k in range(1, K):                              # static unrolled taps
        y = y + win[k:k + TM, :] * wdw[k:k + 1, :]
    y = y + bdw_ref[...]                               # (TM, Dp) + (1, Dp)

    # ---- LayerNorm over the D real channels, no affine, eps=1e-6 -------------
    # padded channels of y are exactly 0 (zero weights/bias/input), so sums over
    # Dp lanes equal sums over the real D channels; one-pass mean / E[y^2].
    inv_d = 1.0 / D
    mean = jnp.sum(y, axis=-1, keepdims=True) * inv_d
    ex2 = jnp.sum(y * y, axis=-1, keepdims=True) * inv_d
    var = jnp.maximum(ex2 - mean * mean, 0.0)
    yn = ((y - mean) * lax.rsqrt(var + eps)).astype(jnp.bfloat16)

    # ---- MLP: Linear -> ReLU^2 -> (Dropout p=0) -> Linear, chunked over inner ----
    b1 = b1_ref[...]                                   # f32 (1, INNERp)
    out = jnp.zeros((TM, o_ref.shape[-1]), jnp.float32)
    for c in range(n_chunks):                          # static chunk loop
        lo = c * inner_chunk
        h = jnp.dot(yn, w1_ref[:, lo:lo + inner_chunk],
                    preferred_element_type=jnp.float32)
        h = h + b1[:, lo:lo + inner_chunk]
        h = jnp.maximum(h, 0.0)
        h = (h * h).astype(jnp.bfloat16)               # ReLU^2
        # TODO(synk): dropout p=0.0 -> identity; nonzero p would need pltpu PRNG here.
        out = out + jnp.dot(h, w2_ref[lo:lo + inner_chunk, :],
                            preferred_element_type=jnp.float32)
    out = out + b2_ref[...]
    o_ref[0] = out.astype(o_ref.dtype)


def _pick_tile_and_vmem(T, Dp, INNERp, DOUTp, inner_chunk, K, out_itemsize):
    """Largest row tile (multiple of 8, <= 512) whose working set stays under a
    conservative VMEM target (v7x has 64 MiB/TC); also returns a vmem limit."""
    HALO = _round_up(K - 1, 8)
    # TM-independent resident bytes (upper-bound x block, weights, biases; x2 pipeline bufs)
    x_block_ub = (_round_up(max(T, 8), 512) + HALO) * Dp * 4
    weight_bytes = Dp * INNERp * 2 + INNERp * DOUTp * 2
    small_bytes = (K * Dp + Dp + INNERp + DOUTp) * 4
    fixed = 2 * (x_block_ub + weight_bytes + small_bytes)
    # per-row live bytes: y (f32) + yn (bf16) + h chunk (f32 + bf16) + f32 accumulator
    # + double-buffered output block
    per_row = 6 * Dp + 6 * inner_chunk + 4 * DOUTp + 2 * DOUTp * out_itemsize
    budget = 48 * 1024 * 1024
    tm = 512
    while tm > 64 and fixed + tm * per_row > budget:
        tm //= 2
    tm = max(8, min(tm, _round_up(T, 8)))
    return tm, HALO, weight_bytes, small_bytes, per_row


def conv_mlp_pallas(x, params, *, kernel_size=7, eps=1e-6):
    """x: (B, T, D). Returns (B, T, dim_out). Params are the natural f32 shapes;
    the wrapper lane-pads channels to multiples of 128 and stores matmul weights
    as bf16 (MXU operands), so padded channels contribute exactly zero."""
    w_dw, b_dw, w1, b1, w2, b2 = params
    B, T, D = x.shape
    K = kernel_size
    assert K % 2 == 1, "only odd kernel_size matches PyTorch 'same' padding here"
    pad = K // 2
    inner = w1.shape[1]
    dim_out = w2.shape[1]

    # lane-dense channel dims + row tiling
    Dp = _round_up(D, 128)
    INNERp = _round_up(inner, 128)
    DOUTp = _round_up(dim_out, 128)

    inner_chunk = 512 if INNERp % 512 == 0 else 128
    inner_chunk = min(inner_chunk, INNERp)
    n_chunks = INNERp // inner_chunk

    out_itemsize = jnp.dtype(x.dtype).itemsize
    TM, HALO, weight_bytes, small_bytes, per_row = _pick_tile_and_vmem(
        T, Dp, INNERp, DOUTp, inner_chunk, K, out_itemsize)

    T_pad = _round_up(T, TM)
    n_t = T_pad // TM
    Tp = T_pad + HALO                         # left pad = `pad`, rest zeros on the right

    f32 = jnp.float32
    bf16 = jnp.bfloat16
    xp = jnp.zeros((B, Tp, Dp), f32).at[:, pad:pad + T, :D].set(x.astype(f32))
    wdw_p = jnp.zeros((K, Dp), f32).at[:, :D].set(w_dw.astype(f32))
    bdw_p = jnp.zeros((1, Dp), f32).at[0, :D].set(b_dw.astype(f32))
    w1_p = jnp.zeros((Dp, INNERp), bf16).at[:D, :inner].set(w1.astype(bf16))
    b1_p = jnp.zeros((1, INNERp), f32).at[0, :inner].set(b1.astype(f32))
    w2_p = jnp.zeros((INNERp, DOUTp), bf16).at[:inner, :dim_out].set(w2.astype(bf16))
    b2_p = jnp.zeros((1, DOUTp), f32).at[0, :dim_out].set(b2.astype(f32))

    kernel = functools.partial(_convmlp_kernel, TM=TM, K=K, HALO=HALO, D=D, eps=eps,
                               inner_chunk=inner_chunk, n_chunks=n_chunks)

    # scoped-VMEM limit derived from the real working set (32 MiB floor, 128 MiB cap)
    x_block_bytes = Tp * Dp * 4
    out_block_bytes = TM * DOUTp * out_itemsize
    vmem_needed = (2 * (x_block_bytes + weight_bytes + small_bytes + out_block_bytes)
                   + TM * per_row)
    vmem_limit = int(min(max(int(vmem_needed * 1.25), 32 << 20), 128 << 20))

    # advisory cost estimate for the XLA scheduler
    flops = 2 * B * T_pad * (Dp * INNERp + INNERp * DOUTp + Dp * K)
    bytes_accessed = (xp.size * 4 + w1_p.size * 2 + w2_p.size * 2
                      + (wdw_p.size + bdw_p.size + b1_p.size + b2_p.size) * 4
                      + B * T_pad * DOUTp * out_itemsize)
    cost = pl.CostEstimate(flops=flops, transcendentals=B * T_pad,
                           bytes_accessed=bytes_accessed)

    out = pl.pallas_call(
        kernel,
        out_shape=jax.ShapeDtypeStruct((B, T_pad, DOUTp), x.dtype),
        grid_spec=pltpu.PrefetchScalarGridSpec(
            num_scalar_prefetch=0,
            grid=(B, n_t),
            in_specs=[
                # padded input: DMA'd once per batch element, windowed in-kernel
                pl.BlockSpec((1, Tp, Dp), lambda b, i: (b, 0, 0)),
                pl.BlockSpec((K, Dp), lambda b, i: (0, 0)),        # dw weight (K, Dp)
                pl.BlockSpec((1, Dp), lambda b, i: (0, 0)),        # dw bias
                pl.BlockSpec((Dp, INNERp), lambda b, i: (0, 0)),   # mlp_proj W (bf16)
                pl.BlockSpec((1, INNERp), lambda b, i: (0, 0)),    # mlp_proj b
                pl.BlockSpec((INNERp, DOUTp), lambda b, i: (0, 0)),# mlp_out W (bf16)
                pl.BlockSpec((1, DOUTp), lambda b, i: (0, 0)),     # mlp_out b
            ],
            out_specs=pl.BlockSpec((1, TM, DOUTp), lambda b, i: (b, i, 0)),
        ),
        compiler_params=pltpu.CompilerParams(
            dimension_semantics=("parallel", "parallel"),
            vmem_limit_bytes=vmem_limit),
        cost_estimate=cost,
    )(xp, wdw_p, bdw_p, w1_p, b1_p, w2_p, b2_p)

    return out[:, :T, :dim_out]


def conv_mlp_ref(x, params, *, kernel_size=7, eps=1e-6):
    """Pure-JAX reference mirroring the PyTorch forward. The two Linear layers use
    bf16 operands with f32 accumulation (same MXU numerics as the kernel); a pure
    f32 reference matches within ~5e-2."""
    w_dw, b_dw, w1, b1, w2, b2 = params
    B, T, D = x.shape
    K = kernel_size
    pad = K // 2
    xp = jnp.pad(x, ((0, 0), (pad, pad), (0, 0)))
    y = sum(xp[:, k:k + T, :] * w_dw[k][None, None, :] for k in range(K))
    y = y + b_dw[None, None, :]
    mean = y.mean(-1, keepdims=True)
    var = ((y - mean) ** 2).mean(-1, keepdims=True)
    yn = (y - mean) * lax.rsqrt(var + eps)
    bf = jnp.bfloat16
    h = jnp.dot(yn.astype(bf), w1.astype(bf),
                preferred_element_type=jnp.float32) + b1
    h = jnp.maximum(h, 0.0) ** 2
    return jnp.dot(h.astype(bf), w2.astype(bf),
                   preferred_element_type=jnp.float32) + b2


def init_params(key, dim, dim_out, inner, kernel_size):
    """Deterministic parameter init (shapes match the PyTorch module).
    NOTE: torch dwconv.weight is (dim, 1, K); stored here as (K, dim) WITHOUT
    reversing K (Conv1d is cross-correlation). Linear weights stored transposed."""
    ks = jax.random.split(key, 6)
    w_dw = jax.random.normal(ks[0], (kernel_size, dim), jnp.float32) * (1.0 / kernel_size)
    b_dw = jax.random.normal(ks[1], (dim,), jnp.float32) * 0.1
    w1 = jax.random.normal(ks[2], (dim, inner), jnp.float32) * (1.0 / jnp.sqrt(dim))
    b1 = jax.random.normal(ks[3], (inner,), jnp.float32) * 0.1
    w2 = jax.random.normal(ks[4], (inner, dim_out), jnp.float32) * (1.0 / jnp.sqrt(inner))
    b2 = jax.random.normal(ks[5], (dim_out,), jnp.float32) * 0.1
    return (w_dw, b_dw, w1, b1, w2, b2)


if __name__ == "__main__":
    B, T, D = 2, 16, 16
    MULT = 4
    K = 7
    INNER = int(D * MULT)
    DIM_OUT = D

    key = jax.random.PRNGKey(0)
    kx, kp = jax.random.split(key)
    x = jax.random.normal(kx, (B, T, D), jnp.float32)
    params = init_params(kp, D, DIM_OUT, INNER, K)

    out = jax.block_until_ready(conv_mlp_pallas(x, params, kernel_size=K))
    ref = conv_mlp_ref(x, params, kernel_size=K)

    assert out.shape == (B, T, DIM_OUT)
    max_err = jnp.max(jnp.abs(out - ref))
    assert jnp.allclose(out, ref, rtol=2e-2, atol=2e-2), f"max abs err {max_err}"
    print("KERNEL_OK")
</pallas_src>

<mosaic_0001>
module attributes {stable_mosaic.version = 11 : i64} {
  func.func @_convmlp_kernel(%arg0: i32, %arg1: i32, %arg2: memref<1x24x128xf32, #tpu.memory_space<vmem>>, %arg3: memref<7x128xf32, #tpu.memory_space<vmem>>, %arg4: memref<1x128xf32, #tpu.memory_space<vmem>>, %arg5: memref<128x128xbf16, #tpu.memory_space<vmem>>, %arg6: memref<1x128xf32, #tpu.memory_space<vmem>>, %arg7: memref<128x128xbf16, #tpu.memory_space<vmem>>, %arg8: memref<1x128xf32, #tpu.memory_space<vmem>>, %arg9: memref<1x16x128xf32, #tpu.memory_space<vmem>>) attributes {dimension_semantics = [#tpu.dimension_semantics<parallel>, #tpu.dimension_semantics<parallel>], iteration_bounds = array<i64: 2, 1>, scalar_prefetch = 0 : i64, scratch_operands = 0 : i64, tpu.core_type = #tpu.core_type<tc>, window_params = [{transform_indices = @transform_0, window_bounds = array<i64: 1, 24, 128>}, {pipeline_mode = #tpu.pipeline_mode<synchronous>, transform_indices = @transform_1, window_bounds = array<i64: 7, 128>}, {pipeline_mode = #tpu.pipeline_mode<synchronous>, transform_indices = @transform_2, window_bounds = array<i64: 1, 128>}, {pipeline_mode = #tpu.pipeline_mode<synchronous>, transform_indices = @transform_3, window_bounds = array<i64: 128, 128>}, {pipeline_mode = #tpu.pipeline_mode<synchronous>, transform_indices = @transform_4, window_bounds = array<i64: 1, 128>}, {pipeline_mode = #tpu.pipeline_mode<synchronous>, transform_indices = @transform_5, window_bounds = array<i64: 128, 128>}, {pipeline_mode = #tpu.pipeline_mode<synchronous>, transform_indices = @transform_6, window_bounds = array<i64: 1, 128>}, {transform_indices = @transform_7, window_bounds = array<i64: 1, 16, 128>}]} {
    %c16_i32 = arith.constant 16 : i32
    %0 = arith.muli %arg1, %c16_i32 : i32
    %1 = tpu.assume_multiple %0, 8 : i32
    %c0 = arith.constant 0 : index
    %2 = arith.index_cast %1 : i32 to index
    %c0_0 = arith.constant 0 : index
    %3 = vector.load %arg2[%c0, %2, %c0_0] : memref<1x24x128xf32, #tpu.memory_space<vmem>>, vector<1x24x128xf32>
    %4 = vector.shape_cast %3 : vector<1x24x128xf32> to vector<24x128xf32>
    %c0_1 = arith.constant 0 : index
    %c0_2 = arith.constant 0 : index
    %5 = vector.load %arg3[%c0_1, %c0_2] : memref<7x128xf32, #tpu.memory_space<vmem>>, vector<7x128xf32>
    %6 = vector.extract_strided_slice %4 {offsets = [0, 0], sizes = [16, 128], strides = [1, 1]} : vector<24x128xf32> to vector<16x128xf32>
    %7 = vector.extract_strided_slice %5 {offsets = [0, 0], sizes = [1, 128], strides = [1, 1]} : vector<7x128xf32> to vector<1x128xf32>
    %8 = vector.broadcast %7 : vector<1x128xf32> to vector<16x128xf32>
    %9 = arith.mulf %6, %8 : vector<16x128xf32>
    %10 = vector.extract_strided_slice %4 {offsets = [1, 0], sizes = [16, 128], strides = [1, 1]} : vector<24x128xf32> to vector<16x128xf32>
    %11 = vector.extract_strided_slice %5 {offsets = [1, 0], sizes = [1, 128], strides = [1, 1]} : vector<7x128xf32> to vector<1x128xf32>
    %12 = vector.broadcast %11 : vector<1x128xf32> to vector<16x128xf32>
    %13 = arith.mulf %10, %12 : vector<16x128xf32>
    %14 = arith.addf %9, %13 : vector<16x128xf32>
    %15 = vector.extract_strided_slice %4 {offsets = [2, 0], sizes = [16, 128], strides = [1, 1]} : vector<24x128xf32> to vector<16x128xf32>
    %16 = vector.extract_strided_slice %5 {offsets = [2, 0], sizes = [1, 128], strides = [1, 1]} : vector<7x128xf32> to vector<1x128xf32>
    %17 = vector.broadcast %16 : vector<1x128xf32> to vector<16x128xf32>
    %18 = arith.mulf %15, %17 : vector<16x128xf32>
    %19 = arith.addf %14, %18 : vector<16x128xf32>
    %20 = vector.extract_strided_slice %4 {offsets = [3, 0], sizes = [16, 128], strides = [1, 1]} : vector<24x128xf32> to vector<16x128xf32>
    %21 = vector.extract_strided_slice %5 {offsets = [3, 0], sizes = [1, 128], strides = [1, 1]} : vector<7x128xf32> to vector<1x128xf32>
    %22 = vector.broadcast %21 : vector<1x128xf32> to vector<16x128xf32>
    %23 = arith.mulf %20, %22 : vector<16x128xf32>
    %24 = arith.addf %19, %23 : vector<16x128xf32>
    %25 = vector.extract_strided_slice %4 {offsets = [4, 0], sizes = [16, 128], strides = [1, 1]} : vector<24x128xf32> to vector<16x128xf32>
    %26 = vector.extract_strided_slice %5 {offsets = [4, 0], sizes = [1, 128], strides = [1, 1]} : vector<7x128xf32> to vector<1x128xf32>
    %27 = vector.broadcast %26 : vector<1x128xf32> to vector<16x128xf32>
    %28 = arith.mulf %25, %27 : vector<16x128xf32>
    %29 = arith.addf %24, %28 : vector<16x128xf32>
    %30 = vector.extract_strided_slice %4 {offsets = [5, 0], sizes = [16, 128], strides = [1, 1]} : vector<24x128xf32> to vector<16x128xf32>
    %31 = vector.extract_strided_slice %5 {offsets = [5, 0], sizes = [1, 128], strides = [1, 1]} : vector<7x128xf32> to vector<1x128xf32>
    %32 = vector.broadcast %31 : vector<1x128xf32> to vector<16x128xf32>
    %33 = arith.mulf %30, %32 : vector<16x128xf32>
    %34 = arith.addf %29, %33 : vector<16x128xf32>
    %35 = vector.extract_strided_slice %4 {offsets = [6, 0], sizes = [16, 128], strides = [1, 1]} : vector<24x128xf32> to vector<16x128xf32>
    %36 = vector.extract_strided_slice %5 {offsets = [6, 0], sizes = [1, 128], strides = [1, 1]} : vector<7x128xf32> to vector<1x128xf32>
    %37 = vector.broadcast %36 : vector<1x128xf32> to vector<16x128xf32>
    %38 = arith.mulf %35, %37 : vector<16x128xf32>
    %39 = arith.addf %34, %38 : vector<16x128xf32>
    %c0_3 = arith.constant 0 : index
    %c0_4 = arith.constant 0 : index
    %40 = vector.load %arg4[%c0_3, %c0_4] : memref<1x128xf32, #tpu.memory_space<vmem>>, vector<1x128xf32>
    %41 = vector.broadcast %40 : vector<1x128xf32> to vector<16x128xf32>
    %42 = arith.addf %39, %41 : vector<16x128xf32>
    %cst = arith.constant dense<0.000000e+00> : vector<16xf32>
    %43 = vector.multi_reduction <add>, %42, %cst [1] : vector<16x128xf32> to vector<16xf32>
    %44 = vector.shape_cast %43 : vector<16xf32> to vector<16x1xf32>
    %cst_5 = arith.constant 6.250000e-02 : f32
    %45 = vector.broadcast %cst_5 : f32 to vector<16x1xf32>
    %46 = arith.mulf %44, %45 : vector<16x1xf32>
    %47 = arith.mulf %42, %42 : vector<16x128xf32>
    %cst_6 = arith.constant dense<0.000000e+00> : vector<16xf32>
    %48 = vector.multi_reduction <add>, %47, %cst_6 [1] : vector<16x128xf32> to vector<16xf32>
    %49 = vector.shape_cast %48 : vector<16xf32> to vector<16x1xf32>
    %cst_7 = arith.constant 6.250000e-02 : f32
    %50 = vector.broadcast %cst_7 : f32 to vector<16x1xf32>
    %51 = arith.mulf %49, %50 : vector<16x1xf32>
    %52 = arith.mulf %46, %46 : vector<16x1xf32>
    %53 = arith.subf %51, %52 : vector<16x1xf32>
    %cst_8 = arith.constant 0.000000e+00 : f32
    %54 = vector.broadcast %cst_8 : f32 to vector<16x1xf32>
    %55 = arith.maximumf %53, %54 : vector<16x1xf32>
    %56 = vector.broadcast %46 : vector<16x1xf32> to vector<16x128xf32>
    %57 = arith.subf %42, %56 : vector<16x128xf32>
    %cst_9 = arith.constant 9.99999997E-7 : f32
    %58 = vector.broadcast %cst_9 : f32 to vector<16x1xf32>
    %59 = arith.addf %55, %58 : vector<16x1xf32>
    %60 = math.rsqrt %59 : vector<16x1xf32>
    %61 = vector.broadcast %60 : vector<16x1xf32> to vector<16x128xf32>
    %62 = arith.mulf %57, %61 : vector<16x128xf32>
    %63 = arith.truncf %62 : vector<16x128xf32> to vector<16x128xbf16>
    %c0_10 = arith.constant 0 : index
    %c0_11 = arith.constant 0 : index
    %64 = vector.load %arg6[%c0_10, %c0_11] : memref<1x128xf32, #tpu.memory_space<vmem>>, vector<1x128xf32>
    %cst_12 = arith.constant 0.000000e+00 : f32
    %65 = vector.broadcast %cst_12 : f32 to vector<16x128xf32>
    %c0_13 = arith.constant 0 : index
    %c0_14 = arith.constant 0 : index
    %66 = vector.load %arg5[%c0_13, %c0_14] : memref<128x128xbf16, #tpu.memory_space<vmem>>, vector<128x128xbf16>
    %cst_15 = arith.constant dense<0.000000e+00> : vector<16x128xf32>
    %67 = tpu.matmul %63, %66, %cst_15 {dimension_numbers = #tpu.dot_dimension_numbers<[1], [0], [0], [1], [0, 0, 1, 1], [], []>} : vector<16x128xbf16>, vector<128x128xbf16>, vector<16x128xf32> -> vector<16x128xf32>
    %68 = vector.broadcast %64 : vector<1x128xf32> to vector<16x128xf32>
    %69 = arith.addf %67, %68 : vector<16x128xf32>
    %cst_16 = arith.constant 0.000000e+00 : f32
    %70 = vector.broadcast %cst_16 : f32 to vector<16x128xf32>
    %71 = arith.maximumf %69, %70 : vector<16x128xf32>
    %72 = arith.mulf %71, %71 : vector<16x128xf32>
    %73 = arith.truncf %72 : vector<16x128xf32> to vector<16x128xbf16>
    %c0_17 = arith.constant 0 : index
    %c0_18 = arith.constant 0 : index
    %74 = vector.load %arg7[%c0_17, %c0_18] : memref<128x128xbf16, #tpu.memory_space<vmem>>, vector<128x128xbf16>
    %cst_19 = arith.constant dense<0.000000e+00> : vector<16x128xf32>
    %75 = tpu.matmul %73, %74, %cst_19 {dimension_numbers = #tpu.dot_dimension_numbers<[1], [0], [0], [1], [0, 0, 1, 1], [], []>} : vector<16x128xbf16>, vector<128x128xbf16>, vector<16x128xf32> -> vector<16x128xf32>
    %76 = arith.addf %65, %75 : vector<16x128xf32>
    %c0_20 = arith.constant 0 : index
    %c0_21 = arith.constant 0 : index
    %77 = vector.load %arg8[%c0_20, %c0_21] : memref<1x128xf32, #tpu.memory_space<vmem>>, vector<1x128xf32>
    %78 = vector.broadcast %77 : vector<1x128xf32> to vector<16x128xf32>
    %79 = arith.addf %76, %78 : vector<16x128xf32>
    %c0_22 = arith.constant 0 : index
    %c0_23 = arith.constant 0 : index
    %c0_24 = arith.constant 0 : index
    %80 = vector.load %arg9[%c0_22, %c0_23, %c0_24] : memref<1x16x128xf32, #tpu.memory_space<vmem>>, vector<1x16x128xf32>
    %81 = vector.shape_cast %80 : vector<1x16x128xf32> to vector<16x128xf32>
    %82 = vector.shape_cast %79 : vector<16x128xf32> to vector<1x16x128xf32>
    tpu.vector_store %arg9[%c0_22, %c0_23, %c0_24], %82 {strides = array<i32>} : memref<1x16x128xf32, #tpu.memory_space<vmem>>, vector<1x16x128xf32>,
    return
  }
  func.func @transform_0(%arg0: i32, %arg1: i32) -> (i32, i32, i32) {
    %c0_i32 = arith.constant 0 : i32
    %c0_i32_0 = arith.constant 0 : i32
    %c0_i32_1 = arith.constant 0 : i32
    return %arg0, %c0_i32, %c0_i32_0 : i32, i32, i32
  }
  func.func @transform_1(%arg0: i32, %arg1: i32) -> (i32, i32) {
    %c0_i32 = arith.constant 0 : i32
    %c0_i32_0 = arith.constant 0 : i32
    %c0_i32_1 = arith.constant 0 : i32
    return %c0_i32, %c0_i32_0 : i32, i32
  }
  func.func @transform_2(%arg0: i32, %arg1: i32) -> (i32, i32) {
    %c0_i32 = arith.constant 0 : i32
    %c0_i32_0 = arith.constant 0 : i32
    %c0_i32_1 = arith.constant 0 : i32
    return %c0_i32, %c0_i32_0 : i32, i32
  }
  func.func @transform_3(%arg0: i32, %arg1: i32) -> (i32, i32) {
    %c0_i32 = arith.constant 0 : i32
    %c0_i32_0 = arith.constant 0 : i32
    %c0_i32_1 = arith.constant 0 : i32
    return %c0_i32, %c0_i32_0 : i32, i32
  }
  func.func @transform_4(%arg0: i32, %arg1: i32) -> (i32, i32) {
    %c0_i32 = arith.constant 0 : i32
    %c0_i32_0 = arith.constant 0 : i32
    %c0_i32_1 = arith.constant 0 : i32
    return %c0_i32, %c0_i32_0 : i32, i32
  }
  func.func @transform_5(%arg0: i32, %arg1: i32) -> (i32, i32) {
    %c0_i32 = arith.constant 0 : i32
    %c0_i32_0 = arith.constant 0 : i32
    %c0_i32_1 = arith.constant 0 : i32
    return %c0_i32, %c0_i32_0 : i32, i32
  }
  func.func @transform_6(%arg0: i32, %arg1: i32) -> (i32, i32) {
    %c0_i32 = arith.constant 0 : i32
    %c0_i32_0 = arith.constant 0 : i32
    %c0_i32_1 = arith.constant 0 : i32
    return %c0_i32, %c0_i32_0 : i32, i32
  }
  func.func @transform_7(%arg0: i32, %arg1: i32) -> (i32, i32, i32) {
    %c0_i32 = arith.constant 0 : i32
    %c0_i32_0 = arith.constant 0 : i32
    return %arg0, %arg1, %c0_i32 : i32, i32, i32
  }
}

</mosaic_0001>

<bundles_post_ra>
// kernel: tpu_custom_call.1
= control target key start
LH: loop header
LB: loop body
LE: loop exit
PB: predicated region body
PF: predicated region fallthrough
CT: control target
= control target key end

     0   :  { %s1501_s0 = inlined_call_operand.hbm [shape: f32[2,24,128], index: 0, kind: input, shape index: {}]   ;;  %s1502_s1 = inlined_call_operand.hbm [shape: f32[7,128], index: 1, kind: input, shape index: {}]   ;;  %s1503_s2 = inlined_call_operand.vmem [shape: f32[1,128], index: 2, kind: input, shape index: {}]   ;;  %s1504_s3 = inlined_call_operand.hbm [shape: bf16[128,128], index: 3, kind: input, shape index: {}]   ;;  %s1505_s4 = inlined_call_operand.vmem [shape: f32[1,128], index: 4, kind: input, shape index: {}]   ;;  %s1506_s5 = inlined_call_operand.hbm [shape: bf16[128,128], index: 5, kind: input, shape index: {}]   ;;  %s1507_s6 = inlined_call_operand.vmem [shape: f32[1,128], index: 6, kind: input, shape index: {}]   ;;  %s1508_s7 = inlined_call_operand.hbm [shape: f32[2,16,128], index: 7, kind: output, shape index: {}]  }
   0x1   :  { %1511 = sst [smem:[#allocation16_spill]] %s1502_s1 }
   0x2   :  { %1512 = sst [smem:[#allocation17_spill]] %s1504_s3 }
   0x3   :  { %1513 = sst [smem:[#allocation18_spill]] %s1506_s5 }
   0x4   :  { %12 = vsyncpa [#allocation3], 0 }
   0x5   :  { %14 = vsyncpa [#allocation3 + $0x1], 0 }
   0x6   :  { %15 = vsyncpa [#allocation6], 0 }
   0x7   :  { %16 = vsyncpa [#allocation9], 0 }
   0x8   :  { %17 = vsyncpa [#allocation4], 0 }
   0x9   :  { %19 = vsyncpa [#allocation4 + $0x1], 0  ;;  %s1299_s24 = smov 0   ;;  %s1301_s25 = smov 0  }
   0xa   :  { %s1303_s26 = smov 0   ;;  %s1305_s27 = smov 0  }
   0xb   :  { %s1307_s28 = smov 0   ;;  %s1309_s29 = smov 0  }
   0xc LB: > { %1514 = sst [smem:[#allocation15_spill]] %s1248_s29  ;;  %s830_s30 = sadd.s32 4294967295, %s1248_s29   ;;  %s1248_s29 = sphi %s1309_s29, %s25_s29   ;;  %s1244_s28 = sphi %s1307_s28, %s1530_s28   ;;  %s1240_s27 = sphi %s1305_s27, %s1529_s27   ;;  %s1236_s26 = sphi %s1303_s26, %s1528_s26   ;;  %s1232_s25 = sphi %s1301_s25, %s1527_s25   ;;  %s1228_s24 = sphi %s1299_s24, %s1526_s24  }
   0xd   : > { %s831_s8 = sadd.s32 4294967294, %s1248_s29   ;;  %p57_p0 = scmp.ne.s32.totalorder %s1232_s25, %s1228_s24 }
   0xe   : > { %p1333_p1 = scmp.eq.s32.totalorder %s830_s30, 0  ;;  %p1337_p2 = scmp.eq.s32.totalorder %s830_s30, 1 }
   0xf   : > { %p215_p3 = scmp.eq.s32.totalorder %s831_s8, 1  ;;  %p832_p5 = scmp.ge.s32.totalorder %s1248_s29, 1 }
  0x10   : > { %p1343_p4 = por %p1333_p1, %p57_p0  ;;  %p222_p7 = scmp.lt.s32.totalorder %s1248_s29, 3 }
  0x11   : > { %p1348_p6 = por %p215_p3, %p57_p0  ;;  %s1519_s1 = sld [smem:[#allocation16_spill]] }
  0x12   : > { %p1356_p8 = pnand %p832_p5, %p222_p7  ;;  %p836_p9 = scmp.ge.s32.totalorder %s1248_s29, 2 }
  0x13   : > { %s1250_s17 = smov [#allocation5]   ;;  %s1521_s3 = sld [smem:[#allocation17_spill]] }
  0x14   : > { %p948_p10 = pneg %p1356_p8  ;;  %s236_s18 = sshll.u32 %s1250_s17, 4  ;;  %s237_s18 = int_to_ptr.vmem [resolvable:$true] %s236_s18 }
  0x15   : > { %s1251_s23 = smov [#allocation7]   ;;  %s1252_s8 = smov 64  }
  0x16   : > { %p1368_p11 = pnand %p948_p10, %p1333_p1  ;;  %s250_s30 = sshll.u32 %s1251_s23, 4  ;;  %s251_s30 = int_to_ptr.vmem [resolvable:$true] %s250_s30 }
  0x17   : > { %s234_s15 = sshll.u32 %s1519_s1, 4  ;;  %s1253_s13 = smov 4   ;;  %s235_s15 = int_to_ptr.hbm [resolvable:$true] %s234_s15 }
  0x18   : > { %951 = dma.hbm_to_vmem [thread:$0]  (!%p1368_p11), %s235_s15, 128, %s237_s18, [#allocation6]  }
  0x19   : > { %s248_s21 = sshll.u32 %s1521_s3, 4  ;;  %s1523_s5 = sld [smem:[#allocation18_spill]]  ;;  %s249_s21 = int_to_ptr.hbm [resolvable:$true] %s248_s21 }
  0x1a   : > { %954 = dma.hbm_to_vmem [thread:$0]  (!%p1368_p11), %s249_s21, 1024, %s251_s30, [#allocation6], %s1252_s8, %s1252_s8, %s1253_s13  }
  0x1b   : > { %s1254_s20 = smov [#allocation8]   ;;  %s44_s15 = sadd.s32 1, %s1236_s26 }
  0x1c   : > { %s267_s1 = sshll.u32 %s1254_s20, 4  ;;  %s37_s18 = sadd.s32 1, %s1244_s28  ;;  %s268_s1 = int_to_ptr.vmem [resolvable:$true] %s267_s1 }
  0x1d   : > { %p51_p12 = scmp.ne.s32.totalorder %s1236_s26, %s1232_s25  ;;  %p39_p13 = scmp.ge.s32.totalorder %s37_s18, 2 }
  0x1e   : > { %p52_p0 = scmp.eq.s32.totalorder %s1248_s29, 0  ;;  %p969_p5 = scmp.lt.s32.totalorder %s1248_s29, 2 }
  0x1f   : > { %s265_s19 = sshll.u32 %s1523_s5, 4  ;;  %p1388_p3 = por %p1337_p2, %p51_p12  ;;  %s266_s19 = int_to_ptr.hbm [resolvable:$true] %s265_s19 }
  0x20   : > { %957 = dma.hbm_to_vmem [thread:$0]  (!%p1368_p11), %s266_s19, 1024, %s268_s1, [#allocation9], %s1252_s8, %s1252_s8, %s1253_s13  }
  0x21   : > { %s1532_s18 = smov (%p39_p13, %s37_s18), 0  ;;  %p53_p7 = por %p52_p0, %p51_p12 }
  0x22   : > { %s284_s23 = sand.u32 1, %s1236_s26   ;;  %s41_s30 = ssub.s32 %s1244_s28, %s1532_s18 }
  0x23   : > { %p42_p10 = scmp.eq.s32.totalorder %s41_s30, 0  ;;  %s929_s1 = smul.u32 24, %s284_s23 }
  0x24   : > { %s930_s22 = smul.u32 24, %s1244_s28  ;;  %p959_p11 = pnand %p969_p5, %p53_p7 }
  0x25   : > { %s1400_s8 = scalar_select %p42_p10, %s1236_s26, %s44_s15  }
  0x26   : > { %s293_s10 = scalar_lea.hbm %s1501_s0, %s930_s22  ;;  %s288_s19 = scalar_lea.vmem [#allocation2], %s929_s1 }
  0x27   : > { %s294_s17 = sshll.u32 %s293_s10, 4  ;;  %s296_s20 = sshll.u32 %s288_s19, 4  ;;  %s295_s17 = int_to_ptr.hbm [resolvable:$true] %s294_s17  ;;  %s297_s20 = int_to_ptr.vmem [resolvable:$true] %s296_s20 }
  0x28   : > { %s285_s3 = scalar_lea.sflag [#allocation3], %s284_s23  ;;  %s1255_s5 = smov 128  }
  0x29   : > { %s1256_s29 = smov 8   ;;  %308 = sbr.rel (%p1356_p8) target bundleno = 513 (0x201), region = 48 }
  0x2a   : > { %961 = dma.hbm_to_vmem [thread:$0]  (!%p959_p11), %s295_s17, 384, %s297_s20, %s285_s3, %s1255_s5, %s1255_s5, %s1256_s29  }
  0x2b   : > { %s1408_s15 = sand.u32 (!%p1356_p8), 1, %s1232_s25  }
  0x2c   : > { %s931_s30 = smul.u32 (!%p1356_p8), 24, %s1408_s15  ;;  %s311_s22 = scalar_lea.sflag (!%p1356_p8), [#allocation3], %s1408_s15 }
  0x2e   : > { %s1412_s13 = scalar_lea.vmem [#allocation2], %s931_s30 }
  0x2f   : > { %1211 = dma.done.wait (%p1343_p4), %s311_s22, 384  }
  0x30   : > { %1213 = vsyncadd (%p1343_p4), %s311_s22, 4294966912 }
  0x31   : > { %1215 = dma.done.wait (%p1333_p1), [#allocation6], 1152  }
  0x32   : > { %1217 = vsyncadd (%p1333_p1), [#allocation6], 4294966144 }
  0x33   : > { %1219 = dma.done.wait (%p1333_p1), [#allocation9], 1024  }
  0x34   : > { %1221 = vsyncadd (%p1333_p1), [#allocation9], 4294966272  ;;  %vm378_vm0 = vcmask 1046528   ;;  %vm395_vm1 = vcmask 1045504   ;;  %v364_v0 = vld [vmem:[%s1412_s13] sm:$0xff]  ;;  %v365_v1 = vld [vmem:[%s1412_s13 + $0x8] sm:$0xff] }
  0x35   : > { %v367_v2 = vld [vmem:[#allocation5] sm:$0x7f]  ;;  %vm412_vm2 = vcmask 1044480   ;;  %vm429_vm3 = vcmask 1043456   ;;  %vm446_vm4 = vcmask 1042432   ;;  %vm463_vm5 = vcmask 1041408  }
  0x36   : > { %v368_v3 = vperm.slane %v367_v2, 0  ;;  %v371_v4 = vperm.slane %v367_v2, 1  ;;  %v388_v5 = vperm.slane %v367_v2, 2  ;;  %v405_v6 = vperm.slane %v367_v2, 3  ;;  %v366_v30 = vld [vmem:[%s1412_s13 + $0x10] sm:$0xff]  ;;  %s842_s11 = sshll.u32 %s1408_s15, 4 }
  0x37   : > { %v422_v7 = vperm.slane %v367_v2, 4  ;;  %v439_v8 = vperm.slane %v367_v2, 5  ;;  %v456_v9 = vperm.slane %v367_v2, 6  ;;  %v1031_v61 = vld [vmem:[%s1503_s2] ss:$0 sm:$0xff]  ;;  %s928_s1 = sshll.u32 %s1240_s27, 4 }
  0x38   : > { %v369_v10 = vmul.f32 %v368_v3, %v364_v0  ;;  %v372_v11 = vmul.f32 %v371_v4, %v364_v0  ;;  %v373_v12 = vmul.f32 %v371_v4, %v365_v1  ;;  %v389_v13 = vmul.f32 %v388_v5, %v364_v0  ;;  %s711_s17 = scalar_lea.hbm %s1508_s7, %s928_s1  ;;  %s360_s19 = scalar_lea.vmem [#allocation10], %s842_s11 }
  0x39   : > { %v390_v14 = vmul.f32 %v388_v5, %v365_v1  ;;  %v406_v15 = vmul.f32 %v405_v6, %v364_v0  ;;  %v407_v16 = vmul.f32 %v405_v6, %v365_v1  ;;  %v423_v17 = vmul.f32 %v422_v7, %v364_v0  ;;  %s712_s20 = sshll.u32 %s360_s19, 4  ;;  %s714_s30 = sshll.u32 %s711_s17, 4  ;;  %s713_s20 = int_to_ptr.vmem [resolvable:$true] %s712_s20  ;;  %s715_s30 = int_to_ptr.hbm [resolvable:$true] %s714_s30 }
  0x3a   : > { %v379_v18 = vrot.slane %v372_v11, 1  ;;  %v380_v19 = vrot.slane %v373_v12, 1  ;;  %v396_v20 = vrot.slane %v389_v13, 2  ;;  %v424_v21 = vmul.f32 %v422_v7, %v365_v1  ;;  %s698_s22 = scalar_lea.sflag [#allocation4], %s1408_s15  ;;  %s1172_s13 = sshra.s32 %s715_s30, 4  ;;  %s1173_s13 = int_to_ptr.hbm [resolvable:$true] %s1172_s13 }
  0x3b   : > { %v397_v22 = vrot.slane %v390_v14, 2  ;;  %v413_v23 = vrot.slane %v406_v15, 3  ;;  %v414_v24 = vrot.slane %v407_v16, 3  ;;  %v430_v25 = vrot.slane %v423_v17, 4  ;;  %v919_v14 = vld [vmem:[#allocation7 + $0x38] sm:$0xff]  ;;  %v918_v15 = vld [vmem:[#allocation7 + $0x30] sm:$0xff]  ;;  %p1179_p8 = scmp.lt.s32.totalorder %s1173_s13, %s1508_s7 }
  0x3c   : > { %v381_v26 = vsel %vm378_vm0, %v379_v18, %v380_v19  ;;  %v431_v27 = vrot.slane %v424_v21, 4  ;;  %v440_v28 = vmul.f32 %v439_v8, %v364_v0  ;;  %v441_v29 = vmul.f32 %v439_v8, %v365_v1  ;;  %594 = vmatpush.bf16.msra.mxu0 %v919_v14  ;;  %v917_v16 = vld [vmem:[#allocation7 + $0x28] sm:$0xff]  ;;  %v916_v17 = vld [vmem:[#allocation7 + $0x20] sm:$0xff]  ;;  %v915_v18 = vld [vmem:[#allocation7 + $0x18] sm:$0xff]  ;;  %s1174_s27 = scalar_lea.hbm %s1173_s13, 16  ;;  %s1178_s29 = scalar_lea.hbm %s1508_s7, 32 }
  0x3d   : > { %v386_v31 = vadd.f32 %v381_v26, %v369_v10  ;;  %v398_v32 = vsel %vm395_vm1, %v396_v20, %v397_v22  ;;  %v457_v33 = vmul.f32 %v456_v9, %v364_v0  ;;  %v415_v34 = vsel %vm412_vm2, %v413_v23, %v414_v24  ;;  %v913_v21 = vld [vmem:[#allocation7 + $0x8] sm:$0xff]  ;;  %p1175_p1 = scmp.ne.s32.totalorder %s1173_s13, %s1174_s27  ;;  %p1180_p12 = scmp.lt.s32.totalorder %s1178_s29, %s1174_s27 }
  0x3e   : > { %v447_v35 = vrot.slane %v440_v28, 5  ;;  %v448_v36 = vrot.slane %v441_v29, 5  ;;  %v458_v37 = vmul.f32 %v456_v9, %v365_v1  ;;  %v432_v39 = vsel %vm429_vm3, %v430_v25, %v431_v27 }
  0x3f   : > { %v403_v38 = vadd.f32 %v398_v32, %v386_v31  ;;  %v464_v40 = vrot.slane %v457_v33, 6  ;;  %v374_v41 = vmul.f32 %v371_v4, %v366_v30  ;;  %v370_v43 = vmul.f32 %v368_v3, %v365_v1  ;;  %v927_v32 = vld [vmem:[#allocation8 + $0x38] sm:$0xff]  ;;  %p1176_p2 = pnand %p1175_p1, %p1388_p3  ;;  %p1181_p13 = por %p1180_p12, %p1179_p8 }
  0x40   : > { %v465_v42 = vrot.slane %v458_v37, 6  ;;  %v391_v44 = vmul.f32 %v388_v5, %v366_v30  ;;  %v408_v45 = vmul.f32 %v405_v6, %v366_v30  ;;  %v425_v48 = vmul.f32 %v422_v7, %v366_v30  ;;  %595 = vmatpush.bf16.msra.mxu0 %v918_v15  ;;  %681 = vmatpush.bf16.msra.mxu1 %v927_v32 }
  0x41   : > { %v420_v46 = vadd.f32 %v415_v34, %v403_v38  ;;  %v382_v47 = vrot.slane %v374_v41, 1  ;;  %v442_v49 = vmul.f32 %v439_v8, %v366_v30  ;;  %v449_v50 = vsel %vm446_vm4, %v447_v35, %v448_v36  ;;  %p1177_p4 = pneg %p1176_p2 }
  0x42   : > { %v399_v51 = vrot.slane %v391_v44, 2  ;;  %v416_v52 = vrot.slane %v408_v45, 3  ;;  %v433_v55 = vrot.slane %v425_v48, 4  ;;  %v459_v56 = vmul.f32 %v456_v9, %v366_v30 }
  0x43   : > { %v437_v53 = vadd.f32 %v432_v39, %v420_v46  ;;  %v383_v54 = vsel %vm378_vm0, %v380_v19, %v382_v47  ;;  %v466_v57 = vsel %vm463_vm5, %v464_v40, %v465_v42  ;;  %v450_v63 = vrot.slane %v442_v49, 5  ;;  %v914_v19 = vld [vmem:[#allocation7 + $0x10] sm:$0xff]  ;;  %v925_v39 = vld [vmem:[#allocation8 + $0x28] sm:$0xff]  ;;  %p1182_p0 = pnand %p1181_p13, %p1177_p4 }
  0x44   : > { %v387_v58 = vadd.f32 %v383_v54, %v370_v43  ;;  %v400_v59 = vsel %vm395_vm1, %v397_v22, %v399_v51  ;;  %v417_v62 = vsel %vm412_vm2, %v414_v24, %v416_v52  ;;  %v434_v2 = vsel %vm429_vm3, %v431_v27, %v433_v55  ;;  %596 = vmatpush.bf16.msra.mxu0 %v917_v16  ;;  %v912_v24 = vld [vmem:[#allocation7] sm:$0xff] }
  0x45   : > { %v454_v60 = vadd.f32 %v449_v50, %v437_v53  ;;  %v467_v3 = vrot.slane %v459_v56, 6  ;;  %v451_v6 = vsel %vm446_vm4, %v448_v36, %v450_v63  ;;  %v926_v36 = vld [vmem:[#allocation8 + $0x30] sm:$0xff]  ;;  %v924_v43 = vld [vmem:[#allocation8 + $0x20] sm:$0xff]  ;;  %v921_v63 = vld [vmem:[#allocation8 + $0x8] sm:$0xff] }
  0x46   : > { %v404_v0 = vadd.f32 %v400_v59, %v387_v58  ;;  %682 = vmatpush.bf16.msra.mxu1 %v926_v36 }
  0x47   : > { %v471_v1 = vadd.f32 %v466_v57, %v454_v60  ;;  %v468_v9 = vsel %vm463_vm5, %v465_v42, %v467_v3 }
  0x48   : > { %v421_v4 = vadd.f32 %v417_v62, %v404_v0  ;;  %597 = vmatpush.bf16.msra.mxu0 %v916_v17  ;;  %v922_v62 = vld [vmem:[#allocation8 + $0x10] sm:$0xff]  ;;  %v920_v0 = vld [vmem:[#allocation8] sm:$0xff] }
  0x49   : > { %v1442_v5 = vadd.f32 %v1031_v61, %v471_v1 }
  0x4a   : > { %v438_v7 = vadd.f32 %v434_v2, %v421_v4  ;;  %683 = vmatpush.bf16.msra.mxu1 %v925_v39  ;;  %v1032_v2 = vld [vmem:[%s1505_s4] ss:$0 sm:$0xff] }
  0x4b   : > { %479 = vadd.xlane.f32.xlu0 %v1442_v5  ;;  %v485_v8 = vmul.f32 %v1442_v5, %v1442_v5 }
  0x4c   : > { %v455_v10 = vadd.f32 %v451_v6, %v438_v7  ;;  %598 = vmatpush.bf16.msra.mxu0 %v915_v18 }
  0x4d   : > { %487 = vadd.xlane.f32.xlu1 %v485_v8 }
  0x4e   : > { %v472_v11 = vadd.f32 %v468_v9, %v455_v10  ;;  %684 = vmatpush.bf16.msra.mxu1 %v924_v43 }
  0x50   : > { %v1449_v12 = vadd.f32 %v1031_v61, %v472_v11  ;;  %599 = vmatpush.bf16.msra.mxu0 %v914_v19  ;;  %v923_v61 = vld [vmem:[#allocation8 + $0x18] sm:$0xff]  ;;  %v1033_v11 = vld [vmem:[%s1507_s6] ss:$0 sm:$0xff] }
  0x52   : > { %v486_v13 = vmul.f32 %v1449_v12, %v1449_v12  ;;  %685 = vmatpush.bf16.msra.mxu1 %v923_v61 }
  0x53   : > { %481 = vadd.xlane.f32.xlu0 %v1449_v12 }
  0x54   : > { %600 = vmatpush.bf16.msra.mxu0 %v913_v21 }
  0x55   : > { %489 = vadd.xlane.f32.xlu1 %v486_v13 }
  0x56   : > { %686 = vmatpush.bf16.msra.mxu1 %v922_v62 }
  0x58   : > { %601 = vmatpush.bf16.msra.mxu0 %v912_v24 }
  0x5a   : > { %687 = vmatpush.bf16.msra.mxu1 %v921_v63 }
  0x5e   : > { %688 = vmatpush.bf16.msra.mxu1 %v920_v0 }
  0xbe   : > { %v480_v20 = vpop.xlane.xlu0 %479 }
  0xbf   : > { %v483_v22 = vmul.f32 0.0625, %v480_v20 }
  0xc0   : > { %v488_v23 = vpop.xlane.xlu1 %487 }
  0xc1   : > { %v493_v25 = vmul.f32 %v483_v22, %v483_v22  ;;  %v491_v26 = vmul.f32 0.0625, %v488_v23  ;;  %v499_v55 = vsub.f32 %v1442_v5, %v483_v22 }
  0xc3   : > { %v495_v27 = vsub.f32 %v491_v26, %v493_v25 }
  0xc5   : > { %v497_v28 = vmax.f32 %v495_v27, 0.0 }
  0xc6   : > { %v482_v29 = vpop.xlane.xlu0 %481 }
  0xc7   : > { %v501_v30 = vadd.f32 1e-06, %v497_v28  ;;  %v484_v31 = vmul.f32 0.0625, %v482_v29 }
  0xc8   : > { %v490_v33 = vpop.xlane.xlu1 %489 }
  0xc9   : > { %1034 = vrsqrt.f32 %v501_v30  ;;  %v494_v34 = vmul.f32 %v484_v31, %v484_v31  ;;  %v492_v35 = vmul.f32 0.0625, %v490_v33  ;;  %vm509_vm7 = vweird.f32 %v501_v30 }
  0xca   : > { %v500_v56 = vsub.f32 %v1449_v12, %v484_v31 }
  0xcb   : > { %v496_v37 = vsub.f32 %v492_v35, %v494_v34 }
  0xcd   : > { %v498_v38 = vmax.f32 %v496_v37, 0.0 }
  0xcf   : > { %v1035_v40 = vpop.eup %1034  ;;  %v502_v41 = vadd.f32 1e-06, %v498_v38 }
  0xd0   : > { %v504_v42 = vmul.f32 %v1035_v40, %v501_v30  ;;  %vm510_vm6 = vweird.f32 %v1035_v40 }
  0xd1   : > { %1036 = vrsqrt.f32 %v502_v41  ;;  %vm511_vm9 = vmor %vm509_vm7, %vm510_vm6  ;;  %vm519_vm10 = vweird.f32 %v502_v41 }
  0xd2   : > { %v505_v44 = vmul.f32 %v1035_v40, %v504_v42 }
  0xd4   : > { %v506_v45 = vmul.f32 0.5, %v505_v44 }
  0xd6   : > { %v507_v48 = vsub.f32 1.5, %v506_v45 }
  0xd7   : > { %v1037_v46 = vpop.eup %1036 }
  0xd8   : > { %v514_v47 = vmul.f32 %v1037_v46, %v502_v41  ;;  %v508_v51 = vmul.f32 %v1035_v40, %v507_v48  ;;  %vm520_vm8 = vweird.f32 %v1037_v46 }
  0xd9   : > { %vm521_vm11 = vmor %vm519_vm10, %vm520_vm8 }
  0xda   : > { %v515_v49 = vmul.f32 %v1037_v46, %v514_v47  ;;  %v512_v53 = vsel %vm511_vm9, %v1035_v40, %v508_v51 }
  0xdb   : > { %v523_v58 = vmul.f32 %v512_v53, %v499_v55 }
  0xdc   : > { %v516_v50 = vmul.f32 0.5, %v515_v49 }
  0xde   : > { %v517_v52 = vsub.f32 1.5, %v516_v50 }
  0xe0   : > { %v518_v54 = vmul.f32 %v1037_v46, %v517_v52 }
  0xe2   : > { %v522_v57 = vsel %vm521_vm11, %v1037_v46, %v518_v54 }
  0xe3   : > { %v524_v59 = vmul.f32 %v522_v57, %v500_v56 }
  0xe5   : > { %v525_v60 = vpack.c.bf16 %v524_v59, %v523_v58 }
  0xe7   : > { %602 = vmatmul.bf16.vlgmr.msra.gmra.mxu0 %v525_v60 }
 0x164   : > { %v603_v1 = vpop.f32.mrf.mxu0 }
 0x165   : > { %v604_v3 = vadd.f32 %v1032_v2, %v603_v1 }
 0x167   : > { %v608_v5 = vmax.f32 %v604_v3, 0.0 }
 0x169   : > { %v610_v8 = vmul.f32 %v608_v5, %v608_v5 }
 0x16c   : > { %v605_v4 = vpop.f32.mrf.mxu0 }
 0x16d   : > { %v606_v6 = vadd.f32 %v1032_v2, %v605_v4 }
 0x16f   : > { %v609_v7 = vmax.f32 %v606_v6, 0.0 }
 0x171   : > { %v611_v9 = vmul.f32 %v609_v7, %v609_v7 }
 0x173   : > { %v612_v10 = vpack.c.bf16 %v611_v9, %v610_v8 }
 0x175   : > { %689 = vmatmul.bf16.vlgmr.msra.gmra.mxu1 %v612_v10 }
 0x1f2   : > { %v690_v12 = vpop.f32.mrf.mxu1 }
 0x1f3   : > { %v691_v13 = vadd.f32 %v1033_v11, %v690_v12 }
 0x1f5   : > { %695 = vst [vmem:[%s360_s19] sm:$0xff] %v691_v13 }
 0x1fa   : > { %v692_v14 = vpop.f32.mrf.mxu1 }
 0x1fb   : > { %v693_v15 = vadd.f32 %v1033_v11, %v692_v14 }
 0x1fd   : > { %696 = vst [vmem:[%s360_s19 + $0x8] sm:$0xff] %v693_v15 }
 0x1fe   : > { %1185 = shalt.err (!%p1182_p0)
}
 0x1ff   : > { %s1257_s15 = smov 128   ;;  %s1258_s16 = smov 8  }
 0x200   : > { %946 = dma.vmem_to_hbm [thread:$0]  (%p1388_p3), %s713_s20, 256, %s715_s30, %s698_s22, %s1257_s15, %s1257_s15, %s1258_s16  }
 0x201 PF: > { %s1525_s23 = sld [smem:[#allocation15_spill]]  ;;  %s729_s1 = sand.u32 1, %s1228_s24  }
 0x202   : > { %p963_p5 = pnand %p836_p9, %p1348_p6  ;;  %s730_s14 = scalar_lea.sflag [#allocation4], %s729_s1 }
 0x204   : > { %p964_p7 = pneg %p963_p5 }
 0x206   : > { %1223 = dma.done.wait (%p964_p7), %s730_s14, 256  }
 0x207   : > { %1225 = vsyncadd (%p964_p7), %s730_s14, 4294967040  ;;  %s25_s29 = sadd.s32 1, %s1525_s23   ;;  %s1526_s24 = smov %s1232_s25 }
 0x208   : > { %p22_p10 = scmp.ge.s32.totalorder %s25_s29, 4   ;;  %s1527_s25 = smov %s1236_s26 }
 0x209   : > { %s1528_s26 = smov %s1400_s8  ;;  %s1529_s27 = smov %s1244_s28 }
 0x20a   : > { %s1530_s28 = smov %s1532_s18  ;;  %24 = sbr.rel (!%p22_p10) target bundleno = 12 (0xc), region = 106 }
 0x20f   :  { %736 = vsyncpa [#allocation3], 1 }
 0x210   :  { %738 = vsyncpa [#allocation3 + $0x1], 1 }
 0x211   :  { %739 = vsyncpa [#allocation6], 1 }
 0x212   :  { %740 = vsyncpa [#allocation9], 1 }
 0x213   :  { %741 = vsyncpa [#allocation4], 1 }
 0x214   :  { %743 = vsyncpa [#allocation4 + $0x1], 1 }

</bundles_post_ra>
